<compile_context>
chip_gen: v7x
topology: tpu7x:2x2x1
jax: 0.10.0
libtpu: 0.0.40
codegen_flags: <defaults>
</compile_context>

<pallas_src>
import math

import jax
import jax.numpy as jnp
from jax import lax
from jax.experimental import pallas as pl
from jax.experimental.pallas import tpu as pltpu


def top_branch_kernel(x_ref, w_ref, b_ref, o_ref):
    # x_ref : (1, H+2, W*Cin)   lane-dense input rows, zero halo row top/bottom
    # w_ref : (3, W*Cin, W*Cout) banded composed-3x3 weights (compute dtype)
    # b_ref : (1, W*Cout)        f32 bias row (composed bias + W-edge corrections)
    # o_ref : (1, H, W*Cout)     lane-dense output rows
    H = o_ref.shape[1]
    cdt = w_ref.dtype
    x = x_ref[0]                                    # (H+2, W*Cin)

    # Three H-tap matmuls on row-shifted views; W-taps + channel mixing live in
    # the banded weights, so this is the entire conv stack.  K=W*Cin, N=W*Cout.
    acc = jnp.dot(x[0:H].astype(cdt), w_ref[0],
                  preferred_element_type=jnp.float32)          # tap dy = -1
    acc = acc + jnp.dot(x[1:H + 1].astype(cdt), w_ref[1],
                        preferred_element_type=jnp.float32)    # tap dy =  0
    acc = acc + jnp.dot(x[2:H + 2].astype(cdt), w_ref[2],
                        preferred_element_type=jnp.float32)    # tap dy = +1

    # MaxPool2d(1) is the identity.  Store lane-dense.
    o_ref[0] = (acc + b_ref[...]).astype(o_ref.dtype)


def _fold_weights(w1, b1, w2, b2, W, compute_dtype):
    """Compose the separable convs into banded lane-dense matmul weights.

    w1: (Cout, Cin, 3, 1) torch conv3x1 weight
    w2: (Cout, Cout, 1, 3) torch conv1x3 weight
    Returns B (3, W*Cin, W*Cout) in compute_dtype and bias_row (1, W*Cout) f32.
    """
    Cout, Cin = w1.shape[0], w1.shape[1]
    w1_t = w1[:, :, :, 0].astype(jnp.float32)       # (Cmid, Cin, 3)  [c, ci, ky]
    w2_t = w2[:, :, 0, :].astype(jnp.float32)       # (Cout, Cmid, 3) [co, c, kx]

    # Effective 3x3 weight: Weff[co, ci, ky, kx] = sum_c w2[co,c,kx] * w1[c,ci,ky]
    weff = jnp.einsum('ocx,ciy->oiyx', w2_t, w1_t)  # (Cout, Cin, 3, 3)

    # Composed bias + W-edge corrections (conv1x3 zero-pads y, which carries b1).
    beff = b2.astype(jnp.float32) + jnp.einsum('ocx,c->o', w2_t,
                                               b1.astype(jnp.float32))
    c_left = jnp.einsum('oc,c->o', w2_t[:, :, 0], b1.astype(jnp.float32))
    c_right = jnp.einsum('oc,c->o', w2_t[:, :, 2], b1.astype(jnp.float32))
    bias_map = jnp.tile(beff[None, :], (W, 1))                  # (W, Cout)
    bias_map = bias_map.at[0].add(-c_left)
    bias_map = bias_map.at[W - 1].add(-c_right)
    bias_row = bias_map.reshape(1, W * Cout).astype(jnp.float32)

    # Block-banded matrices: B[ky][w_in*Cin+ci, w_out*Cout+co] = Weff[co,ci,ky,kx]
    # where w_in = w_out + kx - 1 (zero outside the band == W zero padding).
    shifts = [jnp.eye(W, k=1 - kx, dtype=jnp.float32) for kx in range(3)]
    bands = []
    for ky in range(3):
        b_ky = (jnp.kron(shifts[0], weff[:, :, ky, 0].T)
                + jnp.kron(shifts[1], weff[:, :, ky, 1].T)
                + jnp.kron(shifts[2], weff[:, :, ky, 2].T))     # (W*Cin, W*Cout)
        bands.append(b_ky)
    B = jnp.stack(bands).astype(compute_dtype)                  # (3, W*Cin, W*Cout)
    return B, bias_row


def top_branch_forward_nhwc(x_nhwc, w1, b1, w2, b2, *,
                            compute_dtype=jnp.bfloat16):
    """NHWC-native path (no layout transposes). x_nhwc: (N, H, W, Cin)."""
    N, H, W, Cin = x_nhwc.shape
    Cout = w1.shape[0]

    B, bias_row = _fold_weights(w1, b1, w2, b2, W, compute_dtype)

    # Single H zero-pad, lane-dense (channels fastest); no halo-window stack.
    xp = jnp.pad(x_nhwc, ((0, 0), (1, 1), (0, 0), (0, 0)))      # (N, H+2, W, Cin)
    xp = xp.reshape(N, H + 2, W * Cin)

    out = pl.pallas_call(
        top_branch_kernel,
        out_shape=jax.ShapeDtypeStruct((N, H, W * Cout), x_nhwc.dtype),
        grid_spec=pltpu.PrefetchScalarGridSpec(
            num_scalar_prefetch=0,
            grid=(N,),
            in_specs=[
                pl.BlockSpec((1, H + 2, W * Cin), lambda n: (n, 0, 0)),
                pl.BlockSpec((3, W * Cin, W * Cout), lambda n: (0, 0, 0)),
                pl.BlockSpec((1, W * Cout), lambda n: (0, 0)),
            ],
            out_specs=pl.BlockSpec((1, H, W * Cout), lambda n: (n, 0, 0)),
        ),
        compiler_params=pltpu.CompilerParams(
            dimension_semantics=("parallel",)),
    )(xp, B, bias_row)

    return out.reshape(N, H, W, Cout)


def top_branch_forward(x_nchw, w1, b1, w2, b2, *, compute_dtype=jnp.bfloat16):
    """PyTorch-layout wrapper: (N, Cin, H, W) -> (N, Cout, H, W).

    The two transposes exist only for drop-in NCHW parity; an NHWC model should
    call top_branch_forward_nhwc directly and pay zero layout cost.
    """
    x_nhwc = jnp.transpose(x_nchw, (0, 2, 3, 1))
    out = top_branch_forward_nhwc(x_nhwc, w1, b1, w2, b2,
                                  compute_dtype=compute_dtype)
    return jnp.transpose(out, (0, 3, 1, 2))


def _reference(x_nchw, w1, b1, w2, b2):
    """Pure-JAX f32 reference using lax.conv (matches torch Conv2d semantics)."""
    dn = lax.conv_dimension_numbers(x_nchw.shape, w1.shape, ("NCHW", "OIHW", "NCHW"))
    y = lax.conv_general_dilated(x_nchw, w1, (1, 1), [(1, 1), (0, 0)],
                                 dimension_numbers=dn)
    y = y + b1.reshape(1, -1, 1, 1)
    dn2 = lax.conv_dimension_numbers(y.shape, w2.shape, ("NCHW", "OIHW", "NCHW"))
    z = lax.conv_general_dilated(y, w2, (1, 1), [(0, 0), (1, 1)],
                                 dimension_numbers=dn2)
    z = z + b2.reshape(1, -1, 1, 1)
    return z   # MaxPool2d(1) == identity


if __name__ == "__main__":
    N, Cin, Cout, H, W = 2, 4, 8, 16, 16
    key = jax.random.PRNGKey(0)
    kx, k1, kb1, k2, kb2 = jax.random.split(key, 5)

    x = jax.random.normal(kx, (N, Cin, H, W), dtype=jnp.float32)

    # Deterministic parameter init (PyTorch-default-like uniform bounds).
    bound1 = 1.0 / math.sqrt(Cin * 3 * 1)
    w1 = jax.random.uniform(k1, (Cout, Cin, 3, 1), jnp.float32, -bound1, bound1)
    b1 = jax.random.uniform(kb1, (Cout,), jnp.float32, -bound1, bound1)
    bound2 = 1.0 / math.sqrt(Cout * 1 * 3)
    w2 = jax.random.uniform(k2, (Cout, Cout, 1, 3), jnp.float32, -bound2, bound2)
    b2 = jax.random.uniform(kb2, (Cout,), jnp.float32, -bound2, bound2)

    ref = _reference(x, w1, b1, w2, b2)

    # 1) strict f32 parity with the PyTorch module (f32 MXU operands).
    out_f32 = top_branch_forward(x, w1, b1, w2, b2, compute_dtype=jnp.float32)
    out_f32 = jax.block_until_ready(out_f32)
    assert out_f32.shape == (N, Cout, H, W), out_f32.shape
    err_f32 = float(jnp.max(jnp.abs(out_f32 - ref)))
    assert err_f32 < 1e-4, err_f32

    # 2) default bf16-operand path (v6e/v7x recommendation): looser tolerance
    #    accounts for bf16 rounding of x and the composed weights (acc is f32).
    out_bf16 = top_branch_forward(x, w1, b1, w2, b2)
    out_bf16 = jax.block_until_ready(out_bf16)
    assert out_bf16.shape == (N, Cout, H, W), out_bf16.shape
    err_bf16 = float(jnp.max(jnp.abs(out_bf16 - ref)))
    assert err_bf16 < 1e-1, err_bf16

    print("KERNEL_OK")
</pallas_src>

<mosaic_0001>
module attributes {stable_mosaic.version = 11 : i64} {
  func.func @top_branch_kernel(%arg0: i32, %arg1: memref<1x18x64xf32, #tpu.memory_space<vmem>>, %arg2: memref<3x64x128xf32, #tpu.memory_space<vmem>>, %arg3: memref<1x128xf32, #tpu.memory_space<vmem>>, %arg4: memref<1x16x128xf32, #tpu.memory_space<vmem>>) attributes {dimension_semantics = [#tpu.dimension_semantics<parallel>], iteration_bounds = array<i64: 2>, scalar_prefetch = 0 : i64, scratch_operands = 0 : i64, tpu.core_type = #tpu.core_type<tc>, window_params = [{transform_indices = @transform_0, window_bounds = array<i64: 1, 18, 64>}, {pipeline_mode = #tpu.pipeline_mode<synchronous>, transform_indices = @transform_1, window_bounds = array<i64: 3, 64, 128>}, {pipeline_mode = #tpu.pipeline_mode<synchronous>, transform_indices = @transform_2, window_bounds = array<i64: 1, 128>}, {transform_indices = @transform_3, window_bounds = array<i64: 1, 16, 128>}]} {
    %c0 = arith.constant 0 : index
    %c0_0 = arith.constant 0 : index
    %c0_1 = arith.constant 0 : index
    %0 = vector.load %arg1[%c0, %c0_0, %c0_1] : memref<1x18x64xf32, #tpu.memory_space<vmem>>, vector<1x18x64xf32>
    %1 = vector.shape_cast %0 : vector<1x18x64xf32> to vector<18x64xf32>
    %2 = vector.extract_strided_slice %1 {offsets = [0, 0], sizes = [16, 64], strides = [1, 1]} : vector<18x64xf32> to vector<16x64xf32>
    %c0_2 = arith.constant 0 : index
    %c0_3 = arith.constant 0 : index
    %c0_4 = arith.constant 0 : index
    %3 = vector.load %arg2[%c0_2, %c0_3, %c0_4] : memref<3x64x128xf32, #tpu.memory_space<vmem>>, vector<1x64x128xf32>
    %4 = vector.shape_cast %3 : vector<1x64x128xf32> to vector<64x128xf32>
    %cst = arith.constant dense<0.000000e+00> : vector<16x128xf32>
    %5 = tpu.matmul %2, %4, %cst {dimension_numbers = #tpu.dot_dimension_numbers<[1], [0], [0], [1], [0, 0, 1, 1], [], []>} : vector<16x64xf32>, vector<64x128xf32>, vector<16x128xf32> -> vector<16x128xf32>
    %6 = vector.extract_strided_slice %1 {offsets = [1, 0], sizes = [16, 64], strides = [1, 1]} : vector<18x64xf32> to vector<16x64xf32>
    %c1 = arith.constant 1 : index
    %c0_5 = arith.constant 0 : index
    %c0_6 = arith.constant 0 : index
    %7 = vector.load %arg2[%c1, %c0_5, %c0_6] : memref<3x64x128xf32, #tpu.memory_space<vmem>>, vector<1x64x128xf32>
    %8 = vector.shape_cast %7 : vector<1x64x128xf32> to vector<64x128xf32>
    %cst_7 = arith.constant dense<0.000000e+00> : vector<16x128xf32>
    %9 = tpu.matmul %6, %8, %cst_7 {dimension_numbers = #tpu.dot_dimension_numbers<[1], [0], [0], [1], [0, 0, 1, 1], [], []>} : vector<16x64xf32>, vector<64x128xf32>, vector<16x128xf32> -> vector<16x128xf32>
    %10 = arith.addf %5, %9 : vector<16x128xf32>
    %11 = vector.extract_strided_slice %1 {offsets = [2, 0], sizes = [16, 64], strides = [1, 1]} : vector<18x64xf32> to vector<16x64xf32>
    %c2 = arith.constant 2 : index
    %c0_8 = arith.constant 0 : index
    %c0_9 = arith.constant 0 : index
    %12 = vector.load %arg2[%c2, %c0_8, %c0_9] : memref<3x64x128xf32, #tpu.memory_space<vmem>>, vector<1x64x128xf32>
    %13 = vector.shape_cast %12 : vector<1x64x128xf32> to vector<64x128xf32>
    %cst_10 = arith.constant dense<0.000000e+00> : vector<16x128xf32>
    %14 = tpu.matmul %11, %13, %cst_10 {dimension_numbers = #tpu.dot_dimension_numbers<[1], [0], [0], [1], [0, 0, 1, 1], [], []>} : vector<16x64xf32>, vector<64x128xf32>, vector<16x128xf32> -> vector<16x128xf32>
    %15 = arith.addf %10, %14 : vector<16x128xf32>
    %c0_11 = arith.constant 0 : index
    %c0_12 = arith.constant 0 : index
    %16 = vector.load %arg3[%c0_11, %c0_12] : memref<1x128xf32, #tpu.memory_space<vmem>>, vector<1x128xf32>
    %17 = vector.broadcast %16 : vector<1x128xf32> to vector<16x128xf32>
    %18 = arith.addf %15, %17 : vector<16x128xf32>
    %c0_13 = arith.constant 0 : index
    %c0_14 = arith.constant 0 : index
    %c0_15 = arith.constant 0 : index
    %19 = vector.load %arg4[%c0_13, %c0_14, %c0_15] : memref<1x16x128xf32, #tpu.memory_space<vmem>>, vector<1x16x128xf32>
    %20 = vector.shape_cast %19 : vector<1x16x128xf32> to vector<16x128xf32>
    %21 = vector.shape_cast %18 : vector<16x128xf32> to vector<1x16x128xf32>
    tpu.vector_store %arg4[%c0_13, %c0_14, %c0_15], %21 {strides = array<i32>} : memref<1x16x128xf32, #tpu.memory_space<vmem>>, vector<1x16x128xf32>,
    return
  }
  func.func @transform_0(%arg0: i32) -> (i32, i32, i32) {
    %c0_i32 = arith.constant 0 : i32
    %c0_i32_0 = arith.constant 0 : i32
    %c0_i32_1 = arith.constant 0 : i32
    return %arg0, %c0_i32, %c0_i32_0 : i32, i32, i32
  }
  func.func @transform_1(%arg0: i32) -> (i32, i32, i32) {
    %c0_i32 = arith.constant 0 : i32
    %c0_i32_0 = arith.constant 0 : i32
    %c0_i32_1 = arith.constant 0 : i32
    %c0_i32_2 = arith.constant 0 : i32
    return %c0_i32, %c0_i32_0, %c0_i32_1 : i32, i32, i32
  }
  func.func @transform_2(%arg0: i32) -> (i32, i32) {
    %c0_i32 = arith.constant 0 : i32
    %c0_i32_0 = arith.constant 0 : i32
    %c0_i32_1 = arith.constant 0 : i32
    return %c0_i32, %c0_i32_0 : i32, i32
  }
  func.func @transform_3(%arg0: i32) -> (i32, i32, i32) {
    %c0_i32 = arith.constant 0 : i32
    %c0_i32_0 = arith.constant 0 : i32
    %c0_i32_1 = arith.constant 0 : i32
    return %arg0, %c0_i32, %c0_i32_0 : i32, i32, i32
  }
}

</mosaic_0001>

<bundles_post_ra>
// kernel: tpu_custom_call.1
= control target key start
LH: loop header
LB: loop body
LE: loop exit
PB: predicated region body
PF: predicated region fallthrough
CT: control target
= control target key end

     0   :  { %8 = vsyncpa [#allocation3], 0  ;;  %s1065_s0 = inlined_call_operand.vmem [shape: f32[2,18,64], index: 0, kind: input, shape index: {}]   ;;  %s1066_s1 = inlined_call_operand.hbm [shape: f32[3,64,128], index: 1, kind: input, shape index: {}]   ;;  %s1067_s2 = inlined_call_operand.vmem [shape: f32[1,128], index: 2, kind: input, shape index: {}]   ;;  %s1068_s3 = inlined_call_operand.hbm [shape: f32[2,16,128], index: 3, kind: output, shape index: {}]  }
   0x1   :  { %9 = vsyncpa [#allocation4], 0 }
   0x2   :  { %11 = vsyncpa [#allocation4 + $0x1], 0  ;;  %s904_s12 = smov 0   ;;  %s906_s13 = smov 0  }
   0x3   :  { %s908_s14 = smov 0   ;;  %s910_s15 = smov 0  }
   0x4 LB: > { %s925_s16 = sadd.s32 4294967295, %s876_s15   ;;  %s567_s17 = sadd.s32 4294967294, %s876_s15   ;;  %s876_s15 = sphi %s910_s15, %s1084_s15   ;;  %s872_s14 = sphi %s908_s14, %s1083_s14   ;;  %s868_s13 = sphi %s906_s13, %s1082_s13   ;;  %s864_s12 = sphi %s904_s12, %s1081_s12  }
   0x5   : > { %s929_s18 = sadd.s32 1, %s876_s15   ;;  %s92_s19 = sadd.s32 1, %s872_s14 }
   0x6   : > { %s89_s20 = ssub.s32 %s876_s15, %s929_s18  ;;  %p102_p0 = scmp.ne.s32.totalorder %s872_s14, %s868_s13 }
   0x7   : > { %p90_p1 = scmp.eq.s32.totalorder %s89_s20, 0  ;;  %p103_p2 = scmp.eq.s32.totalorder %s925_s16, 1 }
   0x8   : > { %p108_p3 = scmp.ne.s32.totalorder %s868_s13, %s864_s12  ;;  %p109_p4 = scmp.eq.s32.totalorder %s567_s17, 1 }
   0x9   : > { %s940_s21 = scalar_select %p90_p1, %s872_s14, %s92_s19  }
   0xa   : > { %p942_p5 = por %p103_p2, %p102_p0  ;;  %p946_p6 = por %p109_p4, %p108_p3 }
   0xb   : > { %p568_p7 = scmp.ge.s32.totalorder %s876_s15, 1  ;;  %p116_p8 = scmp.lt.s32.totalorder %s876_s15, 3 }
   0xc   : > { %s1072_s22 = scalar_select %p942_p5, 1, 0 }
   0xd   : > { %s1073_s23 = scalar_select %p946_p6, 1, 0 }
   0xe   : > { %p1069_p9 = scmp.eq.s32.totalorder %s925_s16, 0  ;;  %p953_p10 = pnand %p568_p7, %p116_p8 }
   0xf   : > { %s878_s25 = smov [#allocation2]   ;;  %s782_s30 = scalar_lea.hbm %s1066_s1, 3072 }
  0x10   : > { %s1074_s24 = scalar_select %p953_p10, 1, 0 }
  0x11   : > { %s128_s26 = sshll.u32 %s878_s25, 4  ;;  %p734_p11 = pneg %p953_p10  ;;  %s129_s26 = int_to_ptr.vmem [resolvable:$true] %s128_s26 }
  0x12   : > { %p783_p13 = scmp.ne.s32.totalorder %s1066_s1, %s782_s30  ;;  %p789_p3 = scmp.lt.u32.totalorder %s782_s30, %s1066_s1 }
  0x13   : > { %p961_p12 = pnand %p1069_p9, %p734_p11 }
  0x15   : > { %p784_p0 = pneg %p961_p12 }
  0x17   : > { %p785_p1 = pnand %p784_p0, %p783_p13 }
  0x19   : > { %p786_p2 = pneg %p785_p1 }
  0x1b   : > { %p791_p4 = pnand %p789_p3, %p786_p2 }
  0x1d   : > { %794 = shalt.err (!%p791_p4)
}
  0x1e   : > { %s795_s8 = scalar_lea.vmem %s129_s26, 3072  ;;  %p803_p9 = scmp.lt.s32.totalorder %s129_s26, %s129_s26 }
  0x1f   : > { %p796_p7 = scmp.ne.s32.totalorder %s129_s26, %s795_s8  ;;  %p804_p6 = scmp.lt.s32.totalorder %s795_s8, %s795_s8 }
  0x21   : > { %p798_p8 = pnand %p796_p7, %p784_p0  ;;  %p805_p5 = por %p804_p6, %p803_p9 }
  0x23   : > { %p799_p11 = pneg %p798_p8 }
  0x25   : > { %p806_p10 = pnand %p805_p5, %p799_p11 }
  0x27   : > { %809 = shalt.err (!%p806_p10)
}
  0x28   : > { %s879_s9 = smov 128   ;;  %s880_s10 = smov 8  }
  0x29   : > { %737 = dma.hbm_to_vmem [thread:$0]  (!%p961_p12), %s1066_s1, 3072, %s129_s26, [#allocation3], %s879_s9, %s879_s9, %s880_s10  }
  0x2a   : > { %p1076_p13 = scmp.ne.s32.totalorder %s1074_s24, 0 }
  0x2b   : > { %p1077_p1 = scmp.eq.s32.totalorder (!%p1076_p13), %s925_s16, 0 }
  0x2c   : > { %155 = sbr.rel (%p1076_p13) target bundleno = 319 (0x13f), region = 32 }
  0x33   : > { %855 = dma.done.wait (%p1077_p1), [#allocation3], 3072   ;;  %p1078_p0 = pmov %p1077_p1 }
  0x34   : > { %p179_p5 = scmp.lt.s32.totalorder %s925_s16, 1  ;;  %v187_v0 = vld [vmem:[#allocation2] sm:$0xff]  ;;  %v188_v1 = vld [vmem:[#allocation2 + $0x8] sm:$0xff]  ;;  %v189_v2 = vld [vmem:[#allocation2 + $0x10] sm:$0xff]  ;;  %vm213_vm0 = vcmask 523264   ;;  %vm207_vm1 = vcmask 1046528  }
  0x35   : > { %857 = vsyncadd (%p1078_p0), [#allocation3], 4294964224  ;;  %v691_v3 = vpack.c.bf16 %v188_v1, %v187_v0  ;;  %v190_v4 = vld [vmem:[#allocation2 + $0x18] sm:$0xff]  ;;  %v191_v6 = vld [vmem:[#allocation2 + $0x20] sm:$0xff]  ;;  %vm381_vm2 = vcmask 1045504   ;;  %s176_s24 = sand.u32 1, %s868_s13  }
  0x36   : > { %s180_s19 = scalar_select %p179_p5, %s925_s16, 1  ;;  %v695_v5 = vpack.c.bf16 %v190_v4, %v189_v2  ;;  %v192_v7 = vld [vmem:[#allocation2 + $0x28] sm:$0xff]  ;;  %v196_v8 = vld [vmem:[#allocation2 + $0x40] sm:$0xff]  ;;  %v193_v15 = vld [vmem:[#allocation2 + $0x30] sm:$0xff] }
  0x37   : > { %692 = vmatprep.subr.bf16.mxu0 %v691_v3  ;;  %v197_v9 = vld [vmem:[#allocation2 + $0x48] sm:$0xff]  ;;  %v699_v14 = vpack.c.bf16 %v192_v7, %v191_v6  ;;  %v198_v16 = vld [vmem:[#allocation2 + $0x50] sm:$0xff]  ;;  %v199_v17 = vld [vmem:[#allocation2 + $0x58] sm:$0xff]  ;;  %s573_s28 = sshll.u32 %s176_s24, 4  ;;  %s587_s6 = sshll.u32 %s925_s16, 8 }
  0x38   : > { %s727_s20 = smul.u32 24, %s180_s19  ;;  %694 = vmatpush3.bf16.msra.mxu0 %v691_v3  ;;  %v675_v11 = vpack.c.bf16 %v197_v9, %v196_v8  ;;  %v194_v19 = vld [vmem:[#allocation2 + $0x38] sm:$0xff]  ;;  %v679_v20 = vpack.c.bf16 %v199_v17, %v198_v16  ;;  %v200_v21 = vld [vmem:[#allocation2 + $0x60] sm:$0xff]  ;;  %v201_v22 = vld [vmem:[#allocation2 + $0x68] sm:$0xff]  ;;  %s178_s4 = scalar_lea.vmem [#allocation5], %s573_s28 }
  0x39   : > { %696 = vmatprep.subr.bf16.mxu0 %v695_v5  ;;  %v683_v24 = vpack.c.bf16 %v201_v22, %v200_v21  ;;  %v703_v25 = vpack.c.bf16 %v194_v19, %v193_v15  ;;  %v202_v26 = vld [vmem:[#allocation2 + $0x70] sm:$0xff]  ;;  %v203_v27 = vld [vmem:[#allocation2 + $0x78] sm:$0xff]  ;;  %v373_v28 = vld [vmem:[#allocation2 + $0x80] sm:$0xff]  ;;  %s493_s5 = sshll.u32 %s178_s4, 4  ;;  %s1022_s9 = scalar_lea.hbm %s1068_s3, %s587_s6  ;;  %s1017_s5 = int_to_ptr.vmem [resolvable:$true] %s493_s5 }
  0x3a   : > { %s992_s26 = scalar_lea.vmem %s1065_s0, %s727_s20  ;;  %676 = vmatprep.subr.bf16.mxu1 %v675_v11  ;;  %v374_v29 = vld [vmem:[#allocation2 + $0x88] sm:$0xff]  ;;  %v687_v31 = vpack.c.bf16 %v203_v27, %v202_v26  ;;  %v375_v35 = vld [vmem:[#allocation2 + $0x90] sm:$0xff]  ;;  %v376_v36 = vld [vmem:[#allocation2 + $0x98] sm:$0xff]  ;;  %s1024_s10 = scalar_lea.sflag [#allocation4], %s176_s24 }
  0x3b   : > { %v184_v10 = vld [vmem:[%s992_s26] sm:$0xff]  ;;  %v997_v13 = vld [vmem:[%s992_s26 + $0x8] sm:$0xff]  ;;  %678 = vmatpush3.bf16.msra.mxu1 %v675_v11  ;;  %v186_v30 = vld [vmem:[%s992_s26 + $0x10] sm:$0x3]  ;;  %v707_v33 = vpack.c.bf16 %v374_v29, %v373_v28  ;;  %v711_v38 = vpack.c.bf16 %v376_v36, %v375_v35  ;;  %s810_s16 = scalar_lea.vmem %s1017_s5, 256  ;;  %p1079_p9 = scmp.ne.s32.totalorder %s1072_s22, 0 }
  0x3c   : > { %v208_v12 = vrot.slane %v184_v10, 1  ;;  %653 = vmatprep.mubr.msk.f32.mxu0 %vm213_vm0, %v184_v10  ;;  %v209_v18 = vrot.slane %v997_v13, 1  ;;  %698 = vmatpush3.bf16.msra.mxu0 %v695_v5  ;;  %v382_v32 = vrot.slane %v184_v10, 2  ;;  %v383_v34 = vrot.slane %v997_v13, 2  ;;  %v377_v40 = vld [vmem:[#allocation2 + $0xa0] sm:$0xff]  ;;  %v378_v41 = vld [vmem:[#allocation2 + $0xa8] sm:$0xff]  ;;  %p811_p6 = scmp.ne.s32.totalorder %s1017_s5, %s810_s16 }
  0x3d   : > { %680 = vmatprep.subr.bf16.mxu1 %v679_v20  ;;  %700 = vmatprep.subr.bf16.mxu0 %v699_v14  ;;  %v211_v37 = vrot.slane %v186_v30, 1  ;;  %v715_v43 = vpack.c.bf16 %v378_v41, %v377_v40  ;;  %v379_v44 = vld [vmem:[#allocation2 + $0xb0] sm:$0xff]  ;;  %v380_v45 = vld [vmem:[#allocation2 + $0xb8] sm:$0xff]  ;;  %v385_v47 = vrot.slane %v186_v30, 2  ;;  %s881_s11 = smov [#allocation5]  }
  0x3e   : > { %v210_v23 = vsel %vm207_vm1, %v208_v12, %v209_v18  ;;  %v384_v39 = vsel %vm381_vm2, %v382_v32, %v383_v34  ;;  %v719_v46 = vpack.c.bf16 %v380_v45, %v379_v44  ;;  %v581_v52 = vld [vmem:[%s1067_s2] ss:$0 sm:$0xff]  ;;  %p812_p10 = pnand %p811_p6, %p1079_p9  ;;  %s814_s17 = sshll.u32 %s881_s11, 4  ;;  %s815_s17 = int_to_ptr.vmem [resolvable:$false] %s814_s17 }
  0x3f   : > { %634 = vmatprep.mubr.msk.f32.mxu1 %vm213_vm0, %v210_v23  ;;  %682 = vmatpush3.bf16.msra.mxu1 %v679_v20  ;;  %v212_v42 = vsel %vm207_vm1, %v209_v18, %v211_v37  ;;  %v386_v48 = vsel %vm381_vm2, %v383_v34, %v385_v47  ;;  %s816_s19 = scalar_lea.vmem %s815_s17, 512  ;;  %p817_p2 = scmp.lt.s32.totalorder %s1017_s5, %s815_s17 }
  0x40   : > { %702 = vmatpush3.bf16.msra.mxu0 %v699_v14  ;;  %684 = vmatprep.subr.bf16.mxu1 %v683_v24  ;;  %p813_p12 = pneg %p812_p10  ;;  %p818_p3 = scmp.lt.s32.totalorder %s816_s19, %s810_s16 }
  0x41   : > { %704 = vmatprep.subr.bf16.mxu0 %v703_v25 }
  0x42   : > { %p819_p4 = por %p818_p3, %p817_p2 }
  0x43   : > { %686 = vmatpush3.bf16.msra.mxu1 %v683_v24 }
  0x44   : > { %706 = vmatpush3.bf16.msra.mxu0 %v703_v25  ;;  %688 = vmatprep.subr.bf16.mxu1 %v687_v31  ;;  %p820_p7 = pnand %p819_p4, %p813_p12 }
  0x45   : > { %708 = vmatprep.subr.bf16.mxu0 %v707_v33 }
  0x47   : > { %654 = vmatmul.mubr.msk.f32.vlgmr.msra.gmra.mrb[0].mxu0 %vm213_vm0, %v997_v13  ;;  %690 = vmatpush3.bf16.msra.mxu1 %v687_v31 }
  0x48   : > { %710 = vmatpush3.bf16.msra.mxu0 %v707_v33  ;;  %672 = vmatprep.mubr.msk.f32.mxu0 %vm213_vm0, %v384_v39 }
  0x49   : > { %712 = vmatprep.subr.bf16.mxu0 %v711_v38 }
  0x4a   : > { %635 = vmatmul.mubr.msk.f32.vlgmr.msra.gmra.mrb[0].mxu1 %vm213_vm0, %v212_v42 }
  0x4c   : > { %714 = vmatpush3.bf16.msra.mxu0 %v711_v38 }
  0x4d   : > { %716 = vmatprep.subr.bf16.mxu0 %v715_v43 }
  0x50   : > { %718 = vmatpush3.bf16.msra.mxu0 %v715_v43 }
  0x51   : > { %720 = vmatprep.subr.bf16.mxu0 %v719_v46 }
  0x54   : > { %722 = vmatpush3.bf16.msra.mxu0 %v719_v46 }
  0x57   : > { %673 = vmatmul.mubr.msk.f32.vlgmr.msra.gmra.mrb[0].mxu0 %vm213_vm0, %v386_v48 }
 0x11d   : > { %v636_v49 = vpop.f32.mrb[0].mxu1 }
 0x11e   : > { %v284_v50 = vpop.f32.mrb[1].mxu1 }
 0x12a   : > { %v674_v51 = vpop.f32.mrb[0].mxu0 }
 0x12b   : > { %v723_v53 = vadd.f32 %v674_v51, %v636_v49  ;;  %v457_v54 = vpop.f32.mrb[1].mxu0 }
 0x12c   : > { %v724_v55 = vadd.f32 %v457_v54, %v284_v50 }
 0x12d   : > { %v476_v56 = vadd.f32 %v723_v53, %v581_v52 }
 0x12e   : > { %v475_v57 = vadd.f32 %v724_v55, %v581_v52 }
 0x12f   : > { %478 = vst [vmem:[%s178_s4 + $0x8] sm:$0xff] %v476_v56 }
 0x130   : > { %477 = vst [vmem:[%s178_s4] sm:$0xff] %v475_v57 }
 0x131   : > { %823 = shalt.err (!%p820_p7)
}
 0x132   : > { %s824_s20 = scalar_lea.hbm %s1022_s9, 256  ;;  %s828_s26 = scalar_lea.hbm %s1068_s3, 512 }
 0x133   : > { %p825_p8 = scmp.ne.s32.totalorder %s1022_s9, %s824_s20  ;;  %p829_p1 = scmp.lt.u32.totalorder %s1022_s9, %s1068_s3 }
 0x134   : > { %p830_p0 = scmp.lt.u32.totalorder %s828_s26, %s824_s20  ;;  %p832_p6 = scmp.lt.u32.totalorder %s824_s20, %s1022_s9 }
 0x135   : > { %p826_p11 = pnand %p825_p8, %p1079_p9 }
 0x136   : > { %p831_p5 = por %p830_p0, %p829_p1 }
 0x137   : > { %p827_p13 = pneg %p826_p11 }
 0x138   : > { %p833_p10 = por %p832_p6, %p831_p5 }
 0x13a   : > { %p834_p12 = pnand %p833_p10, %p827_p13 }
 0x13c   : > { %837 = shalt.err (!%p834_p12)
}
 0x13d   : > { %s882_s29 = smov 128   ;;  %s883_s30 = smov 8  }
 0x13e   : > { %732 = dma.vmem_to_hbm [thread:$0]  (%p1079_p9), %s1017_s5, 256, %s1022_s9, %s1024_s10, %s882_s29, %s882_s29, %s883_s30  }
 0x13f PF: > { %p744_p2 = scmp.ge.s32.totalorder %s876_s15, 2  ;;  %s508_s4 = sand.u32 1, %s864_s12  }
 0x140   : > { %p1080_p3 = scmp.ne.s32.totalorder %s1073_s23, 0  ;;  %s509_s6 = scalar_lea.sflag [#allocation4], %s508_s4 }
 0x142   : > { %p739_p4 = pnand %p744_p2, %p1080_p3 }
 0x144   : > { %859 = dma.done.wait (!%p739_p4), %s509_s6, 256  }
 0x145   : > { %861 = vsyncadd (!%p739_p4), %s509_s6, 4294967040  ;;  %p14_p7 = scmp.ge.s32.totalorder %s929_s18, 4   ;;  %s1081_s12 = smov %s868_s13 }
 0x146   : > { %s1082_s13 = smov %s872_s14  ;;  %s1083_s14 = smov %s940_s21 }
 0x147   : > { %s1084_s15 = smov %s929_s18  ;;  %16 = sbr.rel (!%p14_p7) target bundleno = 4 (0x4), region = 74 }
 0x14e   :  { %514 = vsyncpa [#allocation3], 1 }
 0x14f   :  { %516 = vsyncpa [#allocation3 + $0x1], 1 }
 0x150   :  { %517 = vsyncpa [#allocation4], 1 }
 0x151   :  { %519 = vsyncpa [#allocation4 + $0x1], 1 }

</bundles_post_ra>
